<compile_context>
chip_gen: v7x
topology: tpu7x:2x2x1
jax: 0.10.0
libtpu: 0.0.40
codegen_flags: <defaults>
</compile_context>

<pallas_src>
import math

import jax
import jax.numpy as jnp
from jax.experimental import pallas as pl
from jax.experimental.pallas import tpu as pltpu


def _rotary_kernel(lane_ref, out_ref):
    """Fill one (tile_rows, slab_width) tile of the (slab_rows, slab_width) slab.

    lane_ref : (2, slab_width) f32 — row 0 = group*inv_freq (cat + lane-tiled),
                                     row 1 = (lane//dim)*inv_freq (cat + tiled).
    out_ref  : (tile_rows, slab_width) f32.
    """
    rows = out_ref.shape[0]
    base = pl.program_id(0) * rows                       # global slab-row offset
    r = jax.lax.broadcasted_iota(jnp.int32, (rows, 1), 0) + base
    t = r.astype(jnp.float32)                            # (rows, 1)
    # emb[r*g + q, j] = (r*g + q) * inv[j] == r*(g*inv[j]) + q*inv[j]
    out_ref[...] = t * lane_ref[0:1, :] + lane_ref[1:2, :]


def _choose_tile_rows(n_rows: int, width: int, target_bytes: int = 6 << 20) -> int:
    """Seq-tile height: multiple of 8 (or full extent).

    ~6 MiB tiles => 12 MiB double-buffered writeback: fits v5e's 16 MiB scoped
    VMEM default (v6e/v7x default 32 MiB), so no vmem_limit override needed.
    Slabs >= 2 MiB that already fit one tile are still split ~4-way so the
    "parallel" grid axis has work for both TensorCores on v7x; the extra
    ~0.35us/step is noise on single-TC v5e/v6e.
    """
    row_bytes = width * 4
    total = n_rows * row_bytes
    if total <= target_bytes:
        if total >= (2 << 20) and n_rows >= 32:
            return max(8, pl.cdiv(pl.cdiv(n_rows, 4), 8) * 8)
        return n_rows                    # single full-extent block (always legal)
    return max(8, (target_bytes // row_bytes) // 8 * 8)


def _rotary_reference(max_seq_len: int, dim: int) -> jnp.ndarray:
    """Plain-XLA path (also used as the numerical reference)."""
    inv_freq = 1.0 / (10000.0 ** (jnp.arange(0, dim, 2, dtype=jnp.float32) / dim))
    t = jnp.arange(max_seq_len, dtype=jnp.float32)
    freqs = t[:, None] * inv_freq[None, :]
    emb = jnp.concatenate([freqs, freqs], axis=-1)
    return emb.reshape(1, 1, max_seq_len, dim)


def rotary_embedding(max_seq_len: int, dim: int) -> jnp.ndarray:
    """Returns (1, 1, max_seq_len, dim) float32, matching the PyTorch module."""
    assert dim % 2 == 0, "dim must be even"

    # Degenerate tables: pallas_call launch + per-step overhead dominates,
    # plain XLA is strictly cheaper for sub-tile outputs.
    if max_seq_len * dim * 4 < (64 << 10):
        return _rotary_reference(max_seq_len, dim)

    # __init__ buffer: inv_freq = 1/10000**(arange(0,dim,2)/dim).
    # cat([freqs, freqs], -1) is folded into the per-lane pattern below.
    inv_freq = 1.0 / (10000.0 ** (jnp.arange(0, dim, 2, dtype=jnp.float32) / dim))
    inv_full = jnp.concatenate([inv_freq, inv_freq])                 # (dim,)

    # Lane-dense slab: pack `group` consecutive positions per row so the row
    # width lcm(dim, 128) is a multiple of 128 for any even dim.
    group = 128 // math.gcd(dim, 128)
    slab_width = group * dim
    slab_rows = pl.cdiv(max_seq_len, group)          # padded if n % group != 0

    inv_tiled = jnp.tile(inv_full, group)                            # (slab_width,)
    lane_q = (jnp.arange(slab_width, dtype=jnp.int32) // dim).astype(jnp.float32)
    lane_vecs = jnp.stack([jnp.float32(group) * inv_tiled,           # r-scale vec
                           lane_q * inv_tiled])                      # lane offset
    # lane_vecs: (2, slab_width) f32; group is a power of two so group*inv is exact.

    tile_rows = _choose_tile_rows(slab_rows, slab_width)
    grid = (pl.cdiv(slab_rows, tile_rows),)

    emb_slab = pl.pallas_call(
        _rotary_kernel,
        out_shape=jax.ShapeDtypeStruct((slab_rows, slab_width), jnp.float32),
        grid_spec=pltpu.PrefetchScalarGridSpec(
            num_scalar_prefetch=0,
            grid=grid,
            # Constant block index -> fetched once, not re-DMA'd per grid step.
            in_specs=[pl.BlockSpec((2, slab_width), lambda i: (0, 0))],
            out_specs=pl.BlockSpec((tile_rows, slab_width), lambda i: (i, 0)),
        ),
        compiler_params=pltpu.CompilerParams(
            # Independent seq tiles: shard across both TensorCores on v7x,
            # harmless on single-TC v5e/v6e.
            dimension_semantics=("parallel",),
        ),
    )(lane_vecs)

    # (slab_rows, group*dim) row-major == (slab_rows*group, dim) row-major;
    # slice off the < group-1 padded positions, then add the () () axes.
    emb = emb_slab.reshape(slab_rows * group, dim)[:max_seq_len]
    return emb.reshape(1, 1, max_seq_len, dim)


if __name__ == "__main__":
    # This module's forward is deterministic (index/frequency tables only);
    # PRNGKey kept for convention.
    _ = jax.random.PRNGKey(0)

    shapes = [
        (8, 32),      # tiny table implied by the module -> plain-XLA fast path
        (2048, 80),   # non-power-of-two head dim -> gcd lane grouping (g = 8)
        (1003, 96),   # seq not divisible by group -> padded slab + slice
        (8192, 128),  # group = 1, multi-tile "parallel" grid path
    ]
    for n, d in shapes:
        out = jax.block_until_ready(rotary_embedding(n, d))
        ref = _rotary_reference(n, d)
        assert out.shape == (1, 1, n, d), (n, d, out.shape)
        assert out.dtype == jnp.float32, (n, d, out.dtype)
        assert jnp.allclose(out, ref, rtol=1e-6, atol=1e-6), (n, d)

    print("KERNEL_OK")
</pallas_src>

<mosaic_0001>
module attributes {stable_mosaic.version = 11 : i64} {
  func.func @_rotary_kernel(%arg0: i32, %arg1: memref<2x640xf32, #tpu.memory_space<vmem>>, %arg2: memref<256x640xf32, #tpu.memory_space<vmem>>) attributes {dimension_semantics = [#tpu.dimension_semantics<parallel>], iteration_bounds = array<i64: 1>, scalar_prefetch = 0 : i64, scratch_operands = 0 : i64, tpu.core_type = #tpu.core_type<tc>, window_params = [{pipeline_mode = #tpu.pipeline_mode<synchronous>, transform_indices = @transform_0, window_bounds = array<i64: 2, 640>}, {transform_indices = @transform_1, window_bounds = array<i64: 256, 640>}]} {
    %c256_i32 = arith.constant 256 : i32
    %0 = arith.muli %arg0, %c256_i32 : i32
    %1 = tpu.iota {dimensions = array<i32: 0>} : vector<256x1xi32>
    %2 = vector.broadcast %0 : i32 to vector<256x1xi32>
    %3 = arith.addi %1, %2 : vector<256x1xi32>
    %4 = arith.sitofp %3 : vector<256x1xi32> to vector<256x1xf32>
    %c0 = arith.constant 0 : index
    %c0_0 = arith.constant 0 : index
    %5 = vector.load %arg1[%c0, %c0_0] : memref<2x640xf32, #tpu.memory_space<vmem>>, vector<1x640xf32>
    %6 = vector.broadcast %4 : vector<256x1xf32> to vector<256x640xf32>
    %7 = vector.broadcast %5 : vector<1x640xf32> to vector<256x640xf32>
    %8 = arith.mulf %6, %7 : vector<256x640xf32>
    %c1 = arith.constant 1 : index
    %c0_1 = arith.constant 0 : index
    %9 = vector.load %arg1[%c1, %c0_1] : memref<2x640xf32, #tpu.memory_space<vmem>>, vector<1x640xf32>
    %10 = vector.broadcast %9 : vector<1x640xf32> to vector<256x640xf32>
    %11 = arith.addf %8, %10 : vector<256x640xf32>
    %c0_2 = arith.constant 0 : index
    %c0_3 = arith.constant 0 : index
    %12 = vector.load %arg2[%c0_2, %c0_3] : memref<256x640xf32, #tpu.memory_space<vmem>>, vector<256x640xf32>
    tpu.vector_store %arg2[%c0_2, %c0_3], %11 {strides = array<i32>} : memref<256x640xf32, #tpu.memory_space<vmem>>, vector<256x640xf32>,
    return
  }
  func.func @transform_0(%arg0: i32) -> (i32, i32) {
    %c0_i32 = arith.constant 0 : i32
    %c0_i32_0 = arith.constant 0 : i32
    %c0_i32_1 = arith.constant 0 : i32
    return %c0_i32, %c0_i32_0 : i32, i32
  }
  func.func @transform_1(%arg0: i32) -> (i32, i32) {
    %c0_i32 = arith.constant 0 : i32
    %c0_i32_0 = arith.constant 0 : i32
    return %arg0, %c0_i32 : i32, i32
  }
}

</mosaic_0001>

<bundles_post_ra>
// kernel: tpu_custom_call.1
= control target key start
LH: loop header
LB: loop body
LE: loop exit
PB: predicated region body
PF: predicated region fallthrough
CT: control target
= control target key end

     0   :  { %6 = vsyncpa [#allocation3], 0  ;;  %s1156_s0 = inlined_call_operand.hbm [shape: f32[2,640], index: 0, kind: input, shape index: {}]   ;;  %s1157_s1 = inlined_call_operand.hbm [shape: f32[256,640], index: 1, kind: output, shape index: {}]  }
   0x1   :  { %7 = vsyncpa [#allocation4], 0  ;;  %s724_s6 = smov [#allocation2]   ;;  %s676_s10 = scalar_lea.hbm %s1156_s0, 160 }
   0x2   :  { %s14_s7 = sshll.u32 %s724_s6, 4  ;;  %p677_p0 = scmp.ne.s32.totalorder %s1156_s0, %s676_s10  ;;  %s15_s7 = int_to_ptr.vmem [resolvable:$true] %s14_s7 }
   0x3   :  { %p680_p1 = scmp.lt.u32.totalorder %s676_s10, %s1156_s0 }
   0x5   :  { %p682_p2 = pnand %p680_p1, %p677_p0 }
   0x7   :  { %685 = shalt.err (!%p682_p2)
}
   0x8   :  { %s686_s15 = scalar_lea.vmem %s15_s7, 160  ;;  %p691_p4 = scmp.lt.s32.totalorder %s15_s7, %s15_s7 }
   0x9   :  { %p687_p3 = scmp.ne.s32.totalorder %s15_s7, %s686_s15  ;;  %p692_p5 = scmp.lt.s32.totalorder %s686_s15, %s686_s15 }
   0xb   :  { %p693_p6 = por %p692_p5, %p691_p4 }
   0xd   :  { %p694_p7 = pnand %p693_p6, %p687_p3 }
   0xf   :  { %697 = shalt.err (!%p694_p7)
}
  0x10   :  { %17 = dma.hbm_to_vmem [thread:$0]  %s1156_s0, 160, %s15_s7, [#allocation3]  }
  0x11   :  { %720 = dma.done.wait [#allocation3], 160  }
  0x12   :  { %721 = vsyncadd [#allocation3], 4294967136  ;;  %v22_v0 = vlaneseq  ;;  %v120_v14 = vld [vmem:[#allocation2] ss:$2 sm:$0x1f]  ;;  %s725_s0 = smov [#allocation5]  }
  0x13   :  { %v308_v15 = vld [vmem:[#allocation2 + $0x1] ss:$2 sm:$0x1f]  ;;  %s660_s18 = sshll.u32 %s725_s0, 4  ;;  %s661_s18 = int_to_ptr.vmem [resolvable:$true] %s660_s18 }
  0x14   :  { %v750_v1 = vshrl.u32 %v22_v0, 7  ;;  %s698_s19 = scalar_lea.vmem %s661_s18, 20480  ;;  %p703_p9 = scmp.lt.s32.totalorder %s661_s18, %s661_s18 }
  0x15   :  { %p699_p8 = scmp.ne.s32.totalorder %s661_s18, %s698_s19  ;;  %p704_p10 = scmp.lt.s32.totalorder %s698_s19, %s698_s19 }
  0x16   :  { %v88_v2 = vcvt.s32.f32 %v750_v1  ;;  %v124_v3 = vsub.s32 0, %v750_v1  ;;  %v128_v4 = vsub.s32 1, %v750_v1  ;;  %v132_v5 = vsub.s32 2, %v750_v1 }
  0x17   :  { %v136_v6 = vsub.s32 3, %v750_v1  ;;  %v140_v7 = vsub.s32 4, %v750_v1  ;;  %v24_v8 = vadd.s32 8, %v750_v1  ;;  %v25_v9 = vadd.s32 16, %v750_v1  ;;  %p705_p11 = por %p704_p10, %p703_p9 }
  0x18   :  { %v26_v10 = vadd.s32 24, %v750_v1  ;;  %v762_v11 = vadd.s32 32, %v750_v1  ;;  %v765_v12 = vadd.s32 40, %v750_v1  ;;  %v768_v13 = vadd.s32 48, %v750_v1 }
  0x19   :  { %v89_v16 = vcvt.s32.f32 %v24_v8  ;;  %v90_v17 = vcvt.s32.f32 %v25_v9  ;;  %v770_v18 = vrot.slane %v120_v14, %v124_v3  ;;  %v772_v19 = vrot.slane %v308_v15, %v124_v3  ;;  %p706_p12 = pnand %p705_p11, %p699_p8 }
  0x1a   :  { %v774_v20 = vrot.slane %v120_v14, %v128_v4  ;;  %v776_v21 = vrot.slane %v308_v15, %v128_v4  ;;  %v778_v22 = vrot.slane %v120_v14, %v132_v5  ;;  %v780_v23 = vrot.slane %v308_v15, %v132_v5 }
  0x1b   :  { %v782_v24 = vrot.slane %v120_v14, %v136_v6  ;;  %v784_v25 = vrot.slane %v308_v15, %v136_v6  ;;  %v147_v26 = vmul.f32 %v770_v18, %v88_v2  ;;  %v788_v28 = vrot.slane %v120_v14, %v140_v7 }
  0x1c   :  { %v148_v27 = vmul.f32 %v774_v20, %v88_v2  ;;  %v790_v29 = vrot.slane %v308_v15, %v140_v7  ;;  %v149_v30 = vmul.f32 %v778_v22, %v88_v2  ;;  %v152_v32 = vmul.f32 %v770_v18, %v89_v16 }
  0x1d   :  { %v150_v31 = vmul.f32 %v782_v24, %v88_v2  ;;  %v153_v33 = vmul.f32 %v774_v20, %v89_v16  ;;  %v335_v34 = vadd.f32 %v772_v19, %v147_v26  ;;  %v151_v36 = vmul.f32 %v788_v28, %v88_v2 }
  0x1e   :  { %v336_v35 = vadd.f32 %v776_v21, %v148_v27  ;;  %v154_v37 = vmul.f32 %v778_v22, %v89_v16  ;;  %v337_v38 = vadd.f32 %v780_v23, %v149_v30  ;;  %v340_v40 = vadd.f32 %v772_v19, %v152_v32 }
  0x1f   :  { %v338_v39 = vadd.f32 %v784_v25, %v150_v31  ;;  %v341_v41 = vadd.f32 %v776_v21, %v153_v33  ;;  %495 = vst [vmem:[#allocation5] sm:$0xff] %v335_v34  ;;  %v339_v42 = vadd.f32 %v790_v29, %v151_v36  ;;  %v155_v44 = vmul.f32 %v782_v24, %v89_v16 }
  0x20   :  { %496 = vst [vmem:[#allocation5 + $0x8] sm:$0xff] %v336_v35  ;;  %v342_v43 = vadd.f32 %v780_v23, %v154_v37  ;;  %v156_v45 = vmul.f32 %v788_v28, %v89_v16  ;;  %497 = vst [vmem:[#allocation5 + $0x10] sm:$0xff] %v337_v38  ;;  %v157_v46 = vmul.f32 %v770_v18, %v90_v17  ;;  %v91_v53 = vcvt.s32.f32 %v26_v10 }
  0x21   :  { %498 = vst [vmem:[#allocation5 + $0x18] sm:$0xff] %v338_v39  ;;  %500 = vst [vmem:[#allocation5 + $0x28] sm:$0xff] %v340_v40  ;;  %v158_v47 = vmul.f32 %v774_v20, %v90_v17  ;;  %v159_v48 = vmul.f32 %v778_v22, %v90_v17  ;;  %v160_v49 = vmul.f32 %v782_v24, %v90_v17  ;;  %v92_v0 = vcvt.s32.f32 %v762_v11 }
  0x22   :  { %501 = vst [vmem:[#allocation5 + $0x30] sm:$0xff] %v341_v41  ;;  %499 = vst [vmem:[#allocation5 + $0x20] sm:$0xff] %v339_v42  ;;  %v343_v50 = vadd.f32 %v784_v25, %v155_v44  ;;  %v344_v51 = vadd.f32 %v790_v29, %v156_v45  ;;  %v161_v52 = vmul.f32 %v788_v28, %v90_v17  ;;  %v93_v2 = vcvt.s32.f32 %v765_v12 }
  0x23   :  { %502 = vst [vmem:[#allocation5 + $0x38] sm:$0xff] %v342_v43  ;;  %v345_v54 = vadd.f32 %v772_v19, %v157_v46  ;;  %v346_v55 = vadd.f32 %v776_v21, %v158_v47  ;;  %v347_v56 = vadd.f32 %v780_v23, %v159_v48  ;;  %v348_v57 = vadd.f32 %v784_v25, %v160_v49 }
  0x24   :  { %503 = vst [vmem:[#allocation5 + $0x40] sm:$0xff] %v343_v50  ;;  %504 = vst [vmem:[#allocation5 + $0x48] sm:$0xff] %v344_v51  ;;  %v349_v58 = vadd.f32 %v790_v29, %v161_v52  ;;  %v162_v59 = vmul.f32 %v770_v18, %v91_v53  ;;  %v163_v60 = vmul.f32 %v774_v20, %v91_v53  ;;  %v94_v6 = vcvt.s32.f32 %v768_v13 }
  0x25   :  { %v164_v61 = vmul.f32 %v778_v22, %v91_v53  ;;  %505 = vst [vmem:[#allocation5 + $0x50] sm:$0xff] %v345_v54  ;;  %506 = vst [vmem:[#allocation5 + $0x58] sm:$0xff] %v346_v55  ;;  %v165_v62 = vmul.f32 %v782_v24, %v91_v53  ;;  %v166_v63 = vmul.f32 %v788_v28, %v91_v53  ;;  %v30_v44 = vadd.s32 56, %v750_v1 }
  0x26   :  { %507 = vst [vmem:[#allocation5 + $0x60] sm:$0xff] %v347_v56  ;;  %508 = vst [vmem:[#allocation5 + $0x68] sm:$0xff] %v348_v57  ;;  %v350_v3 = vadd.f32 %v772_v19, %v162_v59  ;;  %v351_v4 = vadd.f32 %v776_v21, %v163_v60  ;;  %v167_v9 = vmul.f32 %v770_v18, %v92_v0  ;;  %v31_v51 = vadd.s32 64, %v750_v1 }
  0x27   :  { %509 = vst [vmem:[#allocation5 + $0x70] sm:$0xff] %v349_v58  ;;  %v352_v5 = vadd.f32 %v780_v23, %v164_v61  ;;  %v353_v7 = vadd.f32 %v784_v25, %v165_v62  ;;  %v354_v8 = vadd.f32 %v790_v29, %v166_v63  ;;  %v168_v10 = vmul.f32 %v774_v20, %v92_v0 }
  0x28   :  { %510 = vst [vmem:[#allocation5 + $0x78] sm:$0xff] %v350_v3  ;;  %511 = vst [vmem:[#allocation5 + $0x80] sm:$0xff] %v351_v4  ;;  %v169_v11 = vmul.f32 %v778_v22, %v92_v0  ;;  %v170_v12 = vmul.f32 %v782_v24, %v92_v0  ;;  %v171_v14 = vmul.f32 %v788_v28, %v92_v0  ;;  %v95_v50 = vcvt.s32.f32 %v30_v44 }
  0x29   :  { %512 = vst [vmem:[#allocation5 + $0x88] sm:$0xff] %v352_v5  ;;  %v172_v15 = vmul.f32 %v770_v18, %v93_v2  ;;  %513 = vst [vmem:[#allocation5 + $0x90] sm:$0xff] %v353_v7  ;;  %v355_v13 = vadd.f32 %v772_v19, %v167_v9  ;;  %v356_v16 = vadd.f32 %v776_v21, %v168_v10  ;;  %v32_v52 = vadd.s32 72, %v750_v1 }
  0x2a   :  { %514 = vst [vmem:[#allocation5 + $0x98] sm:$0xff] %v354_v8  ;;  %v173_v17 = vmul.f32 %v774_v20, %v93_v2  ;;  %v174_v26 = vmul.f32 %v778_v22, %v93_v2  ;;  %v357_v27 = vadd.f32 %v780_v23, %v169_v11  ;;  %v358_v30 = vadd.f32 %v784_v25, %v170_v12 }
  0x2b   :  { %v359_v31 = vadd.f32 %v790_v29, %v171_v14  ;;  %v360_v32 = vadd.f32 %v772_v19, %v172_v15  ;;  %515 = vst [vmem:[#allocation5 + $0xa0] sm:$0xff] %v355_v13  ;;  %516 = vst [vmem:[#allocation5 + $0xa8] sm:$0xff] %v356_v16  ;;  %v175_v35 = vmul.f32 %v782_v24, %v93_v2  ;;  %v33_v53 = vadd.s32 80, %v750_v1 }
  0x2c   :  { %v361_v33 = vadd.f32 %v776_v21, %v173_v17  ;;  %v362_v34 = vadd.f32 %v780_v23, %v174_v26  ;;  %v176_v36 = vmul.f32 %v788_v28, %v93_v2  ;;  %517 = vst [vmem:[#allocation5 + $0xb0] sm:$0xff] %v357_v27  ;;  %518 = vst [vmem:[#allocation5 + $0xb8] sm:$0xff] %v358_v30  ;;  %v34_v54 = vadd.s32 88, %v750_v1 }
  0x2d   :  { %519 = vst [vmem:[#allocation5 + $0xc0] sm:$0xff] %v359_v31  ;;  %520 = vst [vmem:[#allocation5 + $0xc8] sm:$0xff] %v360_v32  ;;  %v177_v37 = vmul.f32 %v770_v18, %v94_v6  ;;  %v178_v38 = vmul.f32 %v774_v20, %v94_v6  ;;  %v179_v39 = vmul.f32 %v778_v22, %v94_v6  ;;  %v869_v55 = vadd.s32 96, %v750_v1 }
  0x2e   :  { %v180_v40 = vmul.f32 %v782_v24, %v94_v6  ;;  %521 = vst [vmem:[#allocation5 + $0xd0] sm:$0xff] %v361_v33  ;;  %522 = vst [vmem:[#allocation5 + $0xd8] sm:$0xff] %v362_v34  ;;  %v363_v41 = vadd.f32 %v784_v25, %v175_v35  ;;  %v364_v42 = vadd.f32 %v790_v29, %v176_v36  ;;  %v872_v56 = vadd.s32 104, %v750_v1 }
  0x2f   :  { %v181_v43 = vmul.f32 %v788_v28, %v94_v6  ;;  %v365_v45 = vadd.f32 %v772_v19, %v177_v37  ;;  %v366_v46 = vadd.f32 %v776_v21, %v178_v38  ;;  %v367_v47 = vadd.f32 %v780_v23, %v179_v39 }
  0x30   :  { %v368_v48 = vadd.f32 %v784_v25, %v180_v40  ;;  %523 = vst [vmem:[#allocation5 + $0xe0] sm:$0xff] %v363_v41  ;;  %524 = vst [vmem:[#allocation5 + $0xe8] sm:$0xff] %v364_v42  ;;  %v182_v57 = vmul.f32 %v770_v18, %v95_v50  ;;  %v183_v58 = vmul.f32 %v774_v20, %v95_v50  ;;  %v96_v62 = vcvt.s32.f32 %v31_v51 }
  0x31   :  { %v369_v49 = vadd.f32 %v790_v29, %v181_v43  ;;  %525 = vst [vmem:[#allocation5 + $0xf0] sm:$0xff] %v365_v45  ;;  %526 = vst [vmem:[#allocation5 + $0xf8] sm:$0xff] %v366_v46  ;;  %v184_v59 = vmul.f32 %v778_v22, %v95_v50  ;;  %v185_v60 = vmul.f32 %v782_v24, %v95_v50  ;;  %v97_v63 = vcvt.s32.f32 %v32_v52 }
  0x32   :  { %527 = vst [vmem:[#allocation5 + $0x100] sm:$0xff] %v367_v47  ;;  %528 = vst [vmem:[#allocation5 + $0x108] sm:$0xff] %v368_v48  ;;  %v186_v61 = vmul.f32 %v788_v28, %v95_v50  ;;  %v98_v0 = vcvt.s32.f32 %v33_v53  ;;  %v370_v2 = vadd.f32 %v772_v19, %v182_v57  ;;  %v371_v3 = vadd.f32 %v776_v21, %v183_v58 }
  0x33   :  { %529 = vst [vmem:[#allocation5 + $0x110] sm:$0xff] %v369_v49  ;;  %v372_v4 = vadd.f32 %v780_v23, %v184_v59  ;;  %v373_v5 = vadd.f32 %v784_v25, %v185_v60  ;;  %v187_v7 = vmul.f32 %v770_v18, %v96_v62  ;;  %v188_v8 = vmul.f32 %v774_v20, %v96_v62 }
  0x34   :  { %v374_v6 = vadd.f32 %v790_v29, %v186_v61  ;;  %v189_v9 = vmul.f32 %v778_v22, %v96_v62  ;;  %530 = vst [vmem:[#allocation5 + $0x118] sm:$0xff] %v370_v2  ;;  %531 = vst [vmem:[#allocation5 + $0x120] sm:$0xff] %v371_v3  ;;  %v190_v10 = vmul.f32 %v782_v24, %v96_v62  ;;  %v99_v43 = vcvt.s32.f32 %v34_v54 }
  0x35   :  { %532 = vst [vmem:[#allocation5 + $0x128] sm:$0xff] %v372_v4  ;;  %533 = vst [vmem:[#allocation5 + $0x130] sm:$0xff] %v373_v5  ;;  %v191_v11 = vmul.f32 %v788_v28, %v96_v62  ;;  %v192_v12 = vmul.f32 %v770_v18, %v97_v63  ;;  %v193_v14 = vmul.f32 %v774_v20, %v97_v63  ;;  %v100_v53 = vcvt.s32.f32 %v869_v55 }
  0x36   :  { %534 = vst [vmem:[#allocation5 + $0x138] sm:$0xff] %v374_v6  ;;  %v375_v15 = vadd.f32 %v772_v19, %v187_v7  ;;  %v376_v13 = vadd.f32 %v776_v21, %v188_v8  ;;  %v377_v16 = vadd.f32 %v780_v23, %v189_v9  ;;  %v194_v17 = vmul.f32 %v778_v22, %v97_v63 }
  0x37   :  { %v378_v26 = vadd.f32 %v784_v25, %v190_v10  ;;  %v379_v27 = vadd.f32 %v790_v29, %v191_v11  ;;  %v380_v30 = vadd.f32 %v772_v19, %v192_v12  ;;  %v381_v31 = vadd.f32 %v776_v21, %v193_v14 }
  0x38   :  { %535 = vst [vmem:[#allocation5 + $0x140] sm:$0xff] %v375_v15  ;;  %536 = vst [vmem:[#allocation5 + $0x148] sm:$0xff] %v376_v13  ;;  %v382_v32 = vadd.f32 %v780_v23, %v194_v17  ;;  %v195_v33 = vmul.f32 %v782_v24, %v97_v63  ;;  %v196_v34 = vmul.f32 %v788_v28, %v97_v63  ;;  %v101_v54 = vcvt.s32.f32 %v872_v56 }
  0x39   :  { %537 = vst [vmem:[#allocation5 + $0x150] sm:$0xff] %v377_v16  ;;  %v197_v35 = vmul.f32 %v770_v18, %v98_v0  ;;  %538 = vst [vmem:[#allocation5 + $0x158] sm:$0xff] %v378_v26  ;;  %v198_v36 = vmul.f32 %v774_v20, %v98_v0  ;;  %v199_v37 = vmul.f32 %v778_v22, %v98_v0  ;;  %v37_v57 = vadd.s32 112, %v750_v1 }
  0x3a   :  { %539 = vst [vmem:[#allocation5 + $0x160] sm:$0xff] %v379_v27  ;;  %540 = vst [vmem:[#allocation5 + $0x168] sm:$0xff] %v380_v30  ;;  %v200_v38 = vmul.f32 %v782_v24, %v98_v0  ;;  %v201_v39 = vmul.f32 %v788_v28, %v98_v0  ;;  %v383_v40 = vadd.f32 %v784_v25, %v195_v33  ;;  %v38_v17 = vadd.s32 120, %v750_v1 }
  0x3b   :  { %541 = vst [vmem:[#allocation5 + $0x170] sm:$0xff] %v381_v31  ;;  %542 = vst [vmem:[#allocation5 + $0x178] sm:$0xff] %v382_v32  ;;  %v384_v41 = vadd.f32 %v790_v29, %v196_v34  ;;  %v385_v42 = vadd.f32 %v772_v19, %v197_v35  ;;  %v386_v44 = vadd.f32 %v776_v21, %v198_v36  ;;  %v102_v16 = vcvt.s32.f32 %v37_v57 }
  0x3c   :  { %v387_v45 = vadd.f32 %v780_v23, %v199_v37  ;;  %v388_v46 = vadd.f32 %v784_v25, %v200_v38  ;;  %v389_v47 = vadd.f32 %v790_v29, %v201_v39  ;;  %543 = vst [vmem:[#allocation5 + $0x180] sm:$0xff] %v383_v40  ;;  %v202_v48 = vmul.f32 %v770_v18, %v99_v43 }
  0x3d   :  { %544 = vst [vmem:[#allocation5 + $0x188] sm:$0xff] %v384_v41  ;;  %545 = vst [vmem:[#allocation5 + $0x190] sm:$0xff] %v385_v42  ;;  %v203_v49 = vmul.f32 %v774_v20, %v99_v43  ;;  %v204_v50 = vmul.f32 %v778_v22, %v99_v43  ;;  %v205_v51 = vmul.f32 %v782_v24, %v99_v43  ;;  %v39_v26 = vadd.s32 128, %v750_v1 }
  0x3e   :  { %546 = vst [vmem:[#allocation5 + $0x198] sm:$0xff] %v386_v44  ;;  %547 = vst [vmem:[#allocation5 + $0x1a0] sm:$0xff] %v387_v45  ;;  %v206_v52 = vmul.f32 %v788_v28, %v99_v43  ;;  %v390_v58 = vadd.f32 %v772_v19, %v202_v48  ;;  %v207_v63 = vmul.f32 %v770_v18, %v100_v53  ;;  %v40_v27 = vadd.s32 136, %v750_v1 }
  0x3f   :  { %548 = vst [vmem:[#allocation5 + $0x1a8] sm:$0xff] %v388_v46  ;;  %549 = vst [vmem:[#allocation5 + $0x1b0] sm:$0xff] %v389_v47  ;;  %v391_v59 = vadd.f32 %v776_v21, %v203_v49  ;;  %v392_v60 = vadd.f32 %v780_v23, %v204_v50  ;;  %v393_v61 = vadd.f32 %v784_v25, %v205_v51  ;;  %v41_v30 = vadd.s32 144, %v750_v1 }
  0x40   :  { %v394_v62 = vadd.f32 %v790_v29, %v206_v52  ;;  %v208_v0 = vmul.f32 %v774_v20, %v100_v53  ;;  %v209_v55 = vmul.f32 %v778_v22, %v100_v53  ;;  %550 = vst [vmem:[#allocation5 + $0x1b8] sm:$0xff] %v390_v58  ;;  %v210_v56 = vmul.f32 %v782_v24, %v100_v53 }
  0x41   :  { %551 = vst [vmem:[#allocation5 + $0x1c0] sm:$0xff] %v391_v59  ;;  %552 = vst [vmem:[#allocation5 + $0x1c8] sm:$0xff] %v392_v60  ;;  %v211_v2 = vmul.f32 %v788_v28, %v100_v53  ;;  %v212_v3 = vmul.f32 %v770_v18, %v101_v54  ;;  %v213_v4 = vmul.f32 %v774_v20, %v101_v54  ;;  %v103_v38 = vcvt.s32.f32 %v38_v17 }
  0x42   :  { %553 = vst [vmem:[#allocation5 + $0x1d0] sm:$0xff] %v393_v61  ;;  %554 = vst [vmem:[#allocation5 + $0x1d8] sm:$0xff] %v394_v62  ;;  %v395_v5 = vadd.f32 %v772_v19, %v207_v63  ;;  %v396_v6 = vadd.f32 %v776_v21, %v208_v0  ;;  %v397_v7 = vadd.f32 %v780_v23, %v209_v55  ;;  %v104_v41 = vcvt.s32.f32 %v39_v26 }
  0x43   :  { %v214_v8 = vmul.f32 %v778_v22, %v101_v54  ;;  %v398_v9 = vadd.f32 %v784_v25, %v210_v56  ;;  %v399_v10 = vadd.f32 %v790_v29, %v211_v2  ;;  %v400_v11 = vadd.f32 %v772_v19, %v212_v3 }
  0x44   :  { %v401_v12 = vadd.f32 %v776_v21, %v213_v4  ;;  %555 = vst [vmem:[#allocation5 + $0x1e0] sm:$0xff] %v395_v5  ;;  %556 = vst [vmem:[#allocation5 + $0x1e8] sm:$0xff] %v396_v6  ;;  %v215_v15 = vmul.f32 %v782_v24, %v101_v54  ;;  %v216_v13 = vmul.f32 %v788_v28, %v101_v54  ;;  %v105_v42 = vcvt.s32.f32 %v40_v27 }
  0x45   :  { %557 = vst [vmem:[#allocation5 + $0x1f0] sm:$0xff] %v397_v7  ;;  %v402_v14 = vadd.f32 %v780_v23, %v214_v8  ;;  %558 = vst [vmem:[#allocation5 + $0x1f8] sm:$0xff] %v398_v9  ;;  %v217_v33 = vmul.f32 %v770_v18, %v102_v16  ;;  %v218_v34 = vmul.f32 %v774_v20, %v102_v16  ;;  %v106_v7 = vcvt.s32.f32 %v41_v30 }
  0x46   :  { %559 = vst [vmem:[#allocation5 + $0x200] sm:$0xff] %v399_v10  ;;  %560 = vst [vmem:[#allocation5 + $0x208] sm:$0xff] %v400_v11  ;;  %v403_v31 = vadd.f32 %v784_v25, %v215_v15  ;;  %v404_v32 = vadd.f32 %v790_v29, %v216_v13  ;;  %v219_v35 = vmul.f32 %v778_v22, %v102_v16  ;;  %v42_v27 = vadd.s32 152, %v750_v1 }
  0x47   :  { %561 = vst [vmem:[#allocation5 + $0x210] sm:$0xff] %v401_v12  ;;  %562 = vst [vmem:[#allocation5 + $0x218] sm:$0xff] %v402_v14  ;;  %v220_v36 = vmul.f32 %v782_v24, %v102_v16  ;;  %v221_v37 = vmul.f32 %v788_v28, %v102_v16  ;;  %v405_v39 = vadd.f32 %v772_v19, %v217_v33  ;;  %v44_v33 = vadd.s32 168, %v750_v1 }
  0x48   :  { %563 = vst [vmem:[#allocation5 + $0x220] sm:$0xff] %v403_v31  ;;  %564 = vst [vmem:[#allocation5 + $0x228] sm:$0xff] %v404_v32  ;;  %v406_v40 = vadd.f32 %v776_v21, %v218_v34  ;;  %v407_v43 = vadd.f32 %v780_v23, %v219_v35  ;;  %v222_v46 = vmul.f32 %v770_v18, %v103_v38  ;;  %v43_v32 = vadd.s32 160, %v750_v1 }
  0x49   :  { %v408_v44 = vadd.f32 %v784_v25, %v220_v36  ;;  %v409_v45 = vadd.f32 %v790_v29, %v221_v37  ;;  %565 = vst [vmem:[#allocation5 + $0x230] sm:$0xff] %v405_v39  ;;  %v223_v47 = vmul.f32 %v774_v20, %v103_v38  ;;  %v224_v48 = vmul.f32 %v778_v22, %v103_v38 }
  0x4a   :  { %566 = vst [vmem:[#allocation5 + $0x238] sm:$0xff] %v406_v40  ;;  %v225_v49 = vmul.f32 %v782_v24, %v103_v38  ;;  %v226_v50 = vmul.f32 %v788_v28, %v103_v38  ;;  %567 = vst [vmem:[#allocation5 + $0x240] sm:$0xff] %v407_v43  ;;  %v410_v51 = vadd.f32 %v772_v19, %v222_v46  ;;  %v107_v37 = vcvt.s32.f32 %v42_v27 }
  0x4b   :  { %568 = vst [vmem:[#allocation5 + $0x248] sm:$0xff] %v408_v44  ;;  %569 = vst [vmem:[#allocation5 + $0x250] sm:$0xff] %v409_v45  ;;  %v227_v52 = vmul.f32 %v770_v18, %v104_v41  ;;  %v228_v53 = vmul.f32 %v774_v20, %v104_v41  ;;  %v229_v54 = vmul.f32 %v778_v22, %v104_v41  ;;  %v108_v38 = vcvt.s32.f32 %v43_v32 }
  0x4c   :  { %v411_v57 = vadd.f32 %v776_v21, %v223_v47  ;;  %v412_v58 = vadd.f32 %v780_v23, %v224_v48  ;;  %v413_v59 = vadd.f32 %v784_v25, %v225_v49  ;;  %v414_v60 = vadd.f32 %v790_v29, %v226_v50  ;;  %570 = vst [vmem:[#allocation5 + $0x258] sm:$0xff] %v410_v51 }
  0x4d   :  { %v415_v61 = vadd.f32 %v772_v19, %v227_v52  ;;  %v416_v62 = vadd.f32 %v776_v21, %v228_v53  ;;  %v417_v63 = vadd.f32 %v780_v23, %v229_v54  ;;  %v230_v0 = vmul.f32 %v782_v24, %v104_v41 }
  0x4e   :  { %571 = vst [vmem:[#allocation5 + $0x260] sm:$0xff] %v411_v57  ;;  %572 = vst [vmem:[#allocation5 + $0x268] sm:$0xff] %v412_v58  ;;  %v231_v55 = vmul.f32 %v788_v28, %v104_v41  ;;  %v232_v56 = vmul.f32 %v770_v18, %v105_v42  ;;  %v233_v2 = vmul.f32 %v774_v20, %v105_v42  ;;  %v109_v39 = vcvt.s32.f32 %v44_v33 }
  0x4f   :  { %573 = vst [vmem:[#allocation5 + $0x270] sm:$0xff] %v413_v59  ;;  %574 = vst [vmem:[#allocation5 + $0x278] sm:$0xff] %v414_v60  ;;  %v234_v3 = vmul.f32 %v778_v22, %v105_v42  ;;  %v418_v4 = vadd.f32 %v784_v25, %v230_v0  ;;  %v235_v5 = vmul.f32 %v782_v24, %v105_v42  ;;  %v45_v40 = vadd.s32 176, %v750_v1 }
  0x50   :  { %575 = vst [vmem:[#allocation5 + $0x280] sm:$0xff] %v415_v61  ;;  %576 = vst [vmem:[#allocation5 + $0x288] sm:$0xff] %v416_v62  ;;  %v236_v6 = vmul.f32 %v788_v28, %v105_v42  ;;  %v419_v8 = vadd.f32 %v790_v29, %v231_v55  ;;  %v420_v9 = vadd.f32 %v772_v19, %v232_v56  ;;  %v46_v41 = vadd.s32 184, %v750_v1 }
  0x51   :  { %577 = vst [vmem:[#allocation5 + $0x290] sm:$0xff] %v417_v63  ;;  %v421_v10 = vadd.f32 %v776_v21, %v233_v2  ;;  %v422_v11 = vadd.f32 %v780_v23, %v234_v3  ;;  %578 = vst [vmem:[#allocation5 + $0x298] sm:$0xff] %v418_v4  ;;  %v423_v12 = vadd.f32 %v784_v25, %v235_v5  ;;  %v110_v2 = vcvt.s32.f32 %v45_v40 }
  0x52   :  { %v424_v14 = vadd.f32 %v790_v29, %v236_v6  ;;  %v237_v15 = vmul.f32 %v770_v18, %v106_v7  ;;  %v238_v13 = vmul.f32 %v774_v20, %v106_v7  ;;  %579 = vst [vmem:[#allocation5 + $0x2a0] sm:$0xff] %v419_v8  ;;  %580 = vst [vmem:[#allocation5 + $0x2a8] sm:$0xff] %v420_v9  ;;  %v49_v40 = vadd.s32 208, %v750_v1 }
  0x53   :  { %581 = vst [vmem:[#allocation5 + $0x2b0] sm:$0xff] %v421_v10  ;;  %582 = vst [vmem:[#allocation5 + $0x2b8] sm:$0xff] %v422_v11  ;;  %v239_v16 = vmul.f32 %v778_v22, %v106_v7  ;;  %v240_v17 = vmul.f32 %v782_v24, %v106_v7  ;;  %v241_v26 = vmul.f32 %v788_v28, %v106_v7 }
  0x54   :  { %583 = vst [vmem:[#allocation5 + $0x2c0] sm:$0xff] %v423_v12  ;;  %584 = vst [vmem:[#allocation5 + $0x2c8] sm:$0xff] %v424_v14  ;;  %v425_v30 = vadd.f32 %v772_v19, %v237_v15  ;;  %v426_v31 = vadd.f32 %v776_v21, %v238_v13  ;;  %v242_v42 = vmul.f32 %v770_v18, %v107_v37 }
  0x55   :  { %v427_v34 = vadd.f32 %v780_v23, %v239_v16  ;;  %v428_v35 = vadd.f32 %v784_v25, %v240_v17  ;;  %v429_v36 = vadd.f32 %v790_v29, %v241_v26  ;;  %v243_v43 = vmul.f32 %v774_v20, %v107_v37 }
  0x56   :  { %585 = vst [vmem:[#allocation5 + $0x2d0] sm:$0xff] %v425_v30  ;;  %586 = vst [vmem:[#allocation5 + $0x2d8] sm:$0xff] %v426_v31  ;;  %v244_v44 = vmul.f32 %v778_v22, %v107_v37  ;;  %v245_v45 = vmul.f32 %v782_v24, %v107_v37  ;;  %v246_v46 = vmul.f32 %v788_v28, %v107_v37  ;;  %v111_v16 = vcvt.s32.f32 %v46_v41 }
  0x57   :  { %587 = vst [vmem:[#allocation5 + $0x2e0] sm:$0xff] %v427_v34  ;;  %588 = vst [vmem:[#allocation5 + $0x2e8] sm:$0xff] %v428_v35  ;;  %v247_v47 = vmul.f32 %v770_v18, %v108_v38  ;;  %v248_v48 = vmul.f32 %v774_v20, %v108_v38  ;;  %v249_v49 = vmul.f32 %v778_v22, %v108_v38  ;;  %v47_v17 = vadd.s32 192, %v750_v1 }
  0x58   :  { %589 = vst [vmem:[#allocation5 + $0x2f0] sm:$0xff] %v429_v36  ;;  %v430_v50 = vadd.f32 %v772_v19, %v242_v42  ;;  %v431_v51 = vadd.f32 %v776_v21, %v243_v43  ;;  %v432_v52 = vadd.f32 %v780_v23, %v244_v44  ;;  %v433_v53 = vadd.f32 %v784_v25, %v245_v45 }
  0x59   :  { %v434_v54 = vadd.f32 %v790_v29, %v246_v46  ;;  %v435_v57 = vadd.f32 %v772_v19, %v247_v47  ;;  %v436_v58 = vadd.f32 %v776_v21, %v248_v48  ;;  %v437_v59 = vadd.f32 %v780_v23, %v249_v49 }
  0x5a   :  { %590 = vst [vmem:[#allocation5 + $0x2f8] sm:$0xff] %v430_v50  ;;  %591 = vst [vmem:[#allocation5 + $0x300] sm:$0xff] %v431_v51  ;;  %v250_v60 = vmul.f32 %v782_v24, %v108_v38  ;;  %v251_v61 = vmul.f32 %v788_v28, %v108_v38  ;;  %v252_v62 = vmul.f32 %v770_v18, %v109_v39  ;;  %v48_v26 = vadd.s32 200, %v750_v1 }
  0x5b   :  { %592 = vst [vmem:[#allocation5 + $0x308] sm:$0xff] %v432_v52  ;;  %593 = vst [vmem:[#allocation5 + $0x310] sm:$0xff] %v433_v53  ;;  %v253_v63 = vmul.f32 %v774_v20, %v109_v39  ;;  %v254_v0 = vmul.f32 %v778_v22, %v109_v39  ;;  %v255_v55 = vmul.f32 %v782_v24, %v109_v39  ;;  %v112_v38 = vcvt.s32.f32 %v47_v17 }
  0x5c   :  { %594 = vst [vmem:[#allocation5 + $0x318] sm:$0xff] %v434_v54  ;;  %595 = vst [vmem:[#allocation5 + $0x320] sm:$0xff] %v435_v57  ;;  %v256_v56 = vmul.f32 %v788_v28, %v109_v39  ;;  %v438_v3 = vadd.f32 %v784_v25, %v250_v60  ;;  %v439_v4 = vadd.f32 %v790_v29, %v251_v61  ;;  %v113_v39 = vcvt.s32.f32 %v48_v26 }
  0x5d   :  { %596 = vst [vmem:[#allocation5 + $0x328] sm:$0xff] %v436_v58  ;;  %597 = vst [vmem:[#allocation5 + $0x330] sm:$0xff] %v437_v59  ;;  %v440_v5 = vadd.f32 %v772_v19, %v252_v62  ;;  %v441_v6 = vadd.f32 %v776_v21, %v253_v63  ;;  %v442_v7 = vadd.f32 %v780_v23, %v254_v0 }
  0x5e   :  { %v443_v8 = vadd.f32 %v784_v25, %v255_v55  ;;  %v444_v9 = vadd.f32 %v790_v29, %v256_v56  ;;  %v257_v10 = vmul.f32 %v770_v18, %v110_v2  ;;  %598 = vst [vmem:[#allocation5 + $0x338] sm:$0xff] %v438_v3  ;;  %599 = vst [vmem:[#allocation5 + $0x340] sm:$0xff] %v439_v4  ;;  %v114_v56 = vcvt.s32.f32 %v49_v40 }
  0x5f   :  { %600 = vst [vmem:[#allocation5 + $0x348] sm:$0xff] %v440_v5  ;;  %601 = vst [vmem:[#allocation5 + $0x350] sm:$0xff] %v441_v6  ;;  %v258_v11 = vmul.f32 %v774_v20, %v110_v2  ;;  %v259_v12 = vmul.f32 %v778_v22, %v110_v2  ;;  %v260_v14 = vmul.f32 %v782_v24, %v110_v2  ;;  %v51_v3 = vadd.s32 224, %v750_v1 }
  0x60   :  { %v261_v15 = vmul.f32 %v788_v28, %v110_v2  ;;  %602 = vst [vmem:[#allocation5 + $0x358] sm:$0xff] %v442_v7  ;;  %603 = vst [vmem:[#allocation5 + $0x360] sm:$0xff] %v443_v8  ;;  %v445_v13 = vadd.f32 %v772_v19, %v257_v10  ;;  %v262_v33 = vmul.f32 %v770_v18, %v111_v16  ;;  %v50_v2 = vadd.s32 216, %v750_v1 }
  0x61   :  { %604 = vst [vmem:[#allocation5 + $0x368] sm:$0xff] %v444_v9  ;;  %v446_v27 = vadd.f32 %v776_v21, %v258_v11  ;;  %v447_v30 = vadd.f32 %v780_v23, %v259_v12  ;;  %v448_v31 = vadd.f32 %v784_v25, %v260_v14  ;;  %v263_v34 = vmul.f32 %v774_v20, %v111_v16 }
  0x62   :  { %v449_v32 = vadd.f32 %v790_v29, %v261_v15  ;;  %605 = vst [vmem:[#allocation5 + $0x370] sm:$0xff] %v445_v13  ;;  %v264_v35 = vmul.f32 %v778_v22, %v111_v16  ;;  %v265_v36 = vmul.f32 %v782_v24, %v111_v16  ;;  %v266_v37 = vmul.f32 %v788_v28, %v111_v16 }
  0x63   :  { %606 = vst [vmem:[#allocation5 + $0x378] sm:$0xff] %v446_v27  ;;  %607 = vst [vmem:[#allocation5 + $0x380] sm:$0xff] %v447_v30  ;;  %v450_v41 = vadd.f32 %v772_v19, %v262_v33  ;;  %v451_v42 = vadd.f32 %v776_v21, %v263_v34  ;;  %v267_v46 = vmul.f32 %v770_v18, %v112_v38  ;;  %v52_v4 = vadd.s32 232, %v750_v1 }
  0x64   :  { %608 = vst [vmem:[#allocation5 + $0x388] sm:$0xff] %v448_v31  ;;  %609 = vst [vmem:[#allocation5 + $0x390] sm:$0xff] %v449_v32  ;;  %v452_v43 = vadd.f32 %v780_v23, %v264_v35  ;;  %v453_v44 = vadd.f32 %v784_v25, %v265_v36  ;;  %v454_v45 = vadd.f32 %v790_v29, %v266_v37  ;;  %v53_v5 = vadd.s32 240, %v750_v1 }
  0x65   :  { %v268_v47 = vmul.f32 %v774_v20, %v112_v38  ;;  %v269_v48 = vmul.f32 %v778_v22, %v112_v38  ;;  %610 = vst [vmem:[#allocation5 + $0x398] sm:$0xff] %v450_v41  ;;  %611 = vst [vmem:[#allocation5 + $0x3a0] sm:$0xff] %v451_v42  ;;  %v270_v49 = vmul.f32 %v782_v24, %v112_v38  ;;  %v115_v14 = vcvt.s32.f32 %v50_v2 }
  0x66   :  { %612 = vst [vmem:[#allocation5 + $0x3a8] sm:$0xff] %v452_v43  ;;  %613 = vst [vmem:[#allocation5 + $0x3b0] sm:$0xff] %v453_v44  ;;  %v271_v50 = vmul.f32 %v788_v28, %v112_v38  ;;  %v272_v51 = vmul.f32 %v770_v18, %v113_v39  ;;  %v273_v52 = vmul.f32 %v774_v20, %v113_v39  ;;  %v116_v16 = vcvt.s32.f32 %v51_v3 }
  0x67   :  { %614 = vst [vmem:[#allocation5 + $0x3b8] sm:$0xff] %v454_v45  ;;  %v455_v53 = vadd.f32 %v772_v19, %v267_v46  ;;  %v456_v54 = vadd.f32 %v776_v21, %v268_v47  ;;  %v457_v57 = vadd.f32 %v780_v23, %v269_v48  ;;  %v274_v58 = vmul.f32 %v778_v22, %v113_v39 }
  0x68   :  { %v458_v59 = vadd.f32 %v784_v25, %v270_v49  ;;  %v459_v60 = vadd.f32 %v790_v29, %v271_v50  ;;  %v460_v61 = vadd.f32 %v772_v19, %v272_v51  ;;  %v461_v62 = vadd.f32 %v776_v21, %v273_v52 }
  0x69   :  { %615 = vst [vmem:[#allocation5 + $0x3c0] sm:$0xff] %v455_v53  ;;  %616 = vst [vmem:[#allocation5 + $0x3c8] sm:$0xff] %v456_v54  ;;  %v462_v63 = vadd.f32 %v780_v23, %v274_v58  ;;  %v275_v0 = vmul.f32 %v782_v24, %v113_v39  ;;  %v276_v55 = vmul.f32 %v788_v28, %v113_v39  ;;  %v117_v17 = vcvt.s32.f32 %v52_v4 }
  0x6a   :  { %617 = vst [vmem:[#allocation5 + $0x3d0] sm:$0xff] %v457_v57  ;;  %618 = vst [vmem:[#allocation5 + $0x3d8] sm:$0xff] %v458_v59  ;;  %v277_v8 = vmul.f32 %v770_v18, %v114_v56  ;;  %v278_v9 = vmul.f32 %v774_v20, %v114_v56  ;;  %v279_v10 = vmul.f32 %v778_v22, %v114_v56  ;;  %v118_v57 = vcvt.s32.f32 %v53_v5 }
  0x6b   :  { %619 = vst [vmem:[#allocation5 + $0x3e0] sm:$0xff] %v459_v60  ;;  %620 = vst [vmem:[#allocation5 + $0x3e8] sm:$0xff] %v460_v61  ;;  %v463_v6 = vadd.f32 %v784_v25, %v275_v0  ;;  %v464_v7 = vadd.f32 %v790_v29, %v276_v55  ;;  %v280_v11 = vmul.f32 %v782_v24, %v114_v56  ;;  %v54_v4 = vadd.s32 248, %v750_v1 }
  0x6c   :  { %621 = vst [vmem:[#allocation5 + $0x3f0] sm:$0xff] %v461_v62  ;;  %622 = vst [vmem:[#allocation5 + $0x3f8] sm:$0xff] %v462_v63  ;;  %v281_v12 = vmul.f32 %v788_v28, %v114_v56  ;;  %v465_v15 = vadd.f32 %v772_v19, %v277_v8  ;;  %v466_v13 = vadd.f32 %v776_v21, %v278_v9 }
  0x6d   :  { %623 = vst [vmem:[#allocation5 + $0x400] sm:$0xff] %v463_v6  ;;  %624 = vst [vmem:[#allocation5 + $0x408] sm:$0xff] %v464_v7  ;;  %v467_v26 = vadd.f32 %v780_v23, %v279_v10  ;;  %v468_v27 = vadd.f32 %v784_v25, %v280_v11  ;;  %v282_v31 = vmul.f32 %v770_v18, %v115_v14  ;;  %v119_v10 = vcvt.s32.f32 %v54_v4 }
  0x6e   :  { %v469_v30 = vadd.f32 %v790_v29, %v281_v12  ;;  %625 = vst [vmem:[#allocation5 + $0x410] sm:$0xff] %v465_v15  ;;  %626 = vst [vmem:[#allocation5 + $0x418] sm:$0xff] %v466_v13  ;;  %v283_v32 = vmul.f32 %v774_v20, %v115_v14  ;;  %v284_v33 = vmul.f32 %v778_v22, %v115_v14 }
  0x6f   :  { %v285_v34 = vmul.f32 %v782_v24, %v115_v14  ;;  %v286_v35 = vmul.f32 %v788_v28, %v115_v14  ;;  %627 = vst [vmem:[#allocation5 + $0x420] sm:$0xff] %v467_v26  ;;  %628 = vst [vmem:[#allocation5 + $0x428] sm:$0xff] %v468_v27  ;;  %v470_v36 = vadd.f32 %v772_v19, %v282_v31 }
  0x70   :  { %629 = vst [vmem:[#allocation5 + $0x430] sm:$0xff] %v469_v30  ;;  %v287_v37 = vmul.f32 %v770_v18, %v116_v16  ;;  %v288_v38 = vmul.f32 %v774_v20, %v116_v16  ;;  %v289_v39 = vmul.f32 %v778_v22, %v116_v16  ;;  %v471_v40 = vadd.f32 %v776_v21, %v283_v32 }
  0x71   :  { %v472_v41 = vadd.f32 %v780_v23, %v284_v33  ;;  %v473_v42 = vadd.f32 %v784_v25, %v285_v34  ;;  %v474_v43 = vadd.f32 %v790_v29, %v286_v35  ;;  %630 = vst [vmem:[#allocation5 + $0x438] sm:$0xff] %v470_v36  ;;  %v290_v47 = vmul.f32 %v782_v24, %v116_v16 }
  0x72   :  { %v475_v44 = vadd.f32 %v772_v19, %v287_v37  ;;  %v476_v45 = vadd.f32 %v776_v21, %v288_v38  ;;  %v477_v46 = vadd.f32 %v780_v23, %v289_v39  ;;  %631 = vst [vmem:[#allocation5 + $0x440] sm:$0xff] %v471_v40  ;;  %v291_v48 = vmul.f32 %v788_v28, %v116_v16 }
  0x73   :  { %632 = vst [vmem:[#allocation5 + $0x448] sm:$0xff] %v472_v41  ;;  %633 = vst [vmem:[#allocation5 + $0x450] sm:$0xff] %v473_v42  ;;  %v292_v49 = vmul.f32 %v770_v18, %v117_v17  ;;  %v293_v50 = vmul.f32 %v774_v20, %v117_v17  ;;  %v294_v51 = vmul.f32 %v778_v22, %v117_v17 }
  0x74   :  { %634 = vst [vmem:[#allocation5 + $0x458] sm:$0xff] %v474_v43  ;;  %635 = vst [vmem:[#allocation5 + $0x460] sm:$0xff] %v475_v44  ;;  %v478_v52 = vadd.f32 %v784_v25, %v290_v47  ;;  %v295_v53 = vmul.f32 %v782_v24, %v117_v17  ;;  %v296_v54 = vmul.f32 %v788_v28, %v117_v17 }
  0x75   :  { %636 = vst [vmem:[#allocation5 + $0x468] sm:$0xff] %v476_v45  ;;  %637 = vst [vmem:[#allocation5 + $0x470] sm:$0xff] %v477_v46  ;;  %v479_v58 = vadd.f32 %v790_v29, %v291_v48  ;;  %v480_v59 = vadd.f32 %v772_v19, %v292_v49  ;;  %v481_v60 = vadd.f32 %v776_v21, %v293_v50 }
  0x76   :  { %v482_v61 = vadd.f32 %v780_v23, %v294_v51  ;;  %638 = vst [vmem:[#allocation5 + $0x478] sm:$0xff] %v478_v52  ;;  %v483_v62 = vadd.f32 %v784_v25, %v295_v53  ;;  %v484_v63 = vadd.f32 %v790_v29, %v296_v54  ;;  %v297_v0 = vmul.f32 %v770_v18, %v118_v57 }
  0x77   :  { %v298_v55 = vmul.f32 %v774_v20, %v118_v57  ;;  %639 = vst [vmem:[#allocation5 + $0x480] sm:$0xff] %v479_v58  ;;  %640 = vst [vmem:[#allocation5 + $0x488] sm:$0xff] %v480_v59  ;;  %v299_v56 = vmul.f32 %v778_v22, %v118_v57  ;;  %v300_v2 = vmul.f32 %v782_v24, %v118_v57 }
  0x78   :  { %641 = vst [vmem:[#allocation5 + $0x490] sm:$0xff] %v481_v60  ;;  %642 = vst [vmem:[#allocation5 + $0x498] sm:$0xff] %v482_v61  ;;  %v301_v3 = vmul.f32 %v788_v28, %v118_v57  ;;  %v485_v5 = vadd.f32 %v772_v19, %v297_v0  ;;  %v302_v1 = vmul.f32 %v770_v18, %v119_v10 }
  0x79   :  { %643 = vst [vmem:[#allocation5 + $0x4a0] sm:$0xff] %v483_v62  ;;  %644 = vst [vmem:[#allocation5 + $0x4a8] sm:$0xff] %v484_v63  ;;  %v486_v6 = vadd.f32 %v776_v21, %v298_v55  ;;  %v487_v7 = vadd.f32 %v780_v23, %v299_v56  ;;  %v488_v8 = vadd.f32 %v784_v25, %v300_v2 }
  0x7a   :  { %v489_v9 = vadd.f32 %v790_v29, %v301_v3  ;;  %645 = vst [vmem:[#allocation5 + $0x4b0] sm:$0xff] %v485_v5  ;;  %v303_v11 = vmul.f32 %v774_v20, %v119_v10  ;;  %v304_v12 = vmul.f32 %v778_v22, %v119_v10  ;;  %v305_v14 = vmul.f32 %v782_v24, %v119_v10 }
  0x7b   :  { %646 = vst [vmem:[#allocation5 + $0x4b8] sm:$0xff] %v486_v6  ;;  %647 = vst [vmem:[#allocation5 + $0x4c0] sm:$0xff] %v487_v7  ;;  %v306_v15 = vmul.f32 %v788_v28, %v119_v10  ;;  %v490_v13 = vadd.f32 %v772_v19, %v302_v1 }
  0x7c   :  { %648 = vst [vmem:[#allocation5 + $0x4c8] sm:$0xff] %v488_v8  ;;  %649 = vst [vmem:[#allocation5 + $0x4d0] sm:$0xff] %v489_v9  ;;  %v491_v16 = vadd.f32 %v776_v21, %v303_v11  ;;  %v492_v17 = vadd.f32 %v780_v23, %v304_v12  ;;  %v493_v26 = vadd.f32 %v784_v25, %v305_v14 }
  0x7d   :  { %v494_v18 = vadd.f32 %v790_v29, %v306_v15  ;;  %650 = vst [vmem:[#allocation5 + $0x4d8] sm:$0xff] %v490_v13 }
  0x7e   :  { %651 = vst [vmem:[#allocation5 + $0x4e0] sm:$0xff] %v491_v16  ;;  %652 = vst [vmem:[#allocation5 + $0x4e8] sm:$0xff] %v492_v17 }
  0x7f   :  { %653 = vst [vmem:[#allocation5 + $0x4f0] sm:$0xff] %v493_v26  ;;  %654 = vst [vmem:[#allocation5 + $0x4f8] sm:$0xff] %v494_v18 }
  0x80   :  { %709 = shalt.err (!%p706_p12)
}
  0x81   :  { %s710_s22 = scalar_lea.hbm %s1157_s1, 20480 }
  0x82   :  { %p711_p13 = scmp.ne.s32.totalorder %s1157_s1, %s710_s22  ;;  %p714_p0 = scmp.lt.u32.totalorder %s710_s22, %s1157_s1 }
  0x84   :  { %p716_p1 = pnand %p714_p0, %p711_p13 }
  0x86   :  { %719 = shalt.err (!%p716_p1)
}
  0x87   :  { %s726_s27 = smov 640   ;;  %s727_s28 = smov 40  }
  0x88   :  { %666 = dma.vmem_to_hbm [thread:$0]  %s661_s18, 20480, %s1157_s1, [#allocation4], %s726_s27, %s726_s27, %s727_s28  }
  0x89   :  { %722 = dma.done.wait [#allocation4], 20480  }
  0x8a   :  { %723 = vsyncadd [#allocation4], 4294946816 }
  0x8b   :  { %670 = vsyncpa [#allocation3], 1 }
  0x8c   :  { %671 = vsyncpa [#allocation4], 1 }

</bundles_post_ra>
